<compile_context>
chip_gen: v7x
topology: tpu7x:2x2x1
jax: 0.10.0
libtpu: 0.0.40
codegen_flags: <defaults>
</compile_context>

<pallas_src>
import jax
import jax.numpy as jnp
from jax.experimental import pallas as pl
from jax.experimental.pallas import tpu as pltpu

D_IN, H, D_OUT = 2, 20, 1
LANE = 128


def _round_up(n, m):
    return ((n + m - 1) // m) * m


def _mlp_kernel(x_ref, w1_ref, b1_ref, w2_ref, b2_ref,
                w3_ref, b3_ref, w4c_ref, b4_ref, o_ref):
    """One batch tile: x_ref (2, TB) -> o_ref (1, TB); features on sublanes."""
    x = x_ref[...]                                    # (2, TB)
    w1 = w1_ref[...]                                  # (20, 2)

    # Layer 1 (K=2): VPU broadcast-multiply-add; an MXU matmul here would use
    # <2% of the systolic array and only add push/pop latency.
    h = w1[:, 0:1] * x[0:1, :] + w1[:, 1:2] * x[1:2, :] + b1_ref[...]
    h = jnp.maximum(h, 0.0)                           # ReLU, (20, TB)

    # Layers 2 & 3 (20x20): MXU matmuls, results stay lane-dense over batch.
    h = jnp.dot(w2_ref[...], h, preferred_element_type=jnp.float32) + b2_ref[...]
    h = jax.nn.sigmoid(h)                             # EUP
    h = jnp.dot(w3_ref[...], h, preferred_element_type=jnp.float32) + b3_ref[...]
    h = jnp.maximum(h, 0.0)                           # ReLU

    # Layer 4 (N=1): VPU multiply + sublane (XLU) reduction instead of a
    # single-row matmul. w4c is the (20, 1) column form of the (1, 20) weight.
    o_ref[...] = jnp.sum(w4c_ref[...] * h, axis=0, keepdims=True) + b4_ref[...]


def regressor_forward(x, params, *, tile_b=1024):
    """x: (B, 2) float32 -> (B, 1) float32. params use PyTorch-native shapes.

    Note: for tiny B (like the demo) a plain jnp forward is cheaper than any
    Pallas launch; we still run the kernel here to exercise it.
    """
    B = x.shape[0]
    w1, b1 = params["w1"], params["b1"]               # (20, 2),  (20, 1)
    w2, b2 = params["w2"], params["b2"]               # (20, 20), (20, 1)
    w3, b3 = params["w3"], params["b3"]               # (20, 20), (20, 1)
    w4, b4 = params["w4"], params["b4"]               # (1, 20),  (1, 1)
    w4c = w4.T                                        # (20, 1) column form

    # Lane-dense batch tile: multiple of 128, capped at tile_b.  With the
    # transposed layout a double-buffered x/out tile pair costs only
    # ~(2 + 1) * TB * 4B * 2  (~24 KiB at TB=1024), far below the 16/32 MiB
    # scoped VMEM limits on v5e / v6e / v7x, so no vmem_limit override needed.
    TB = min(_round_up(tile_b, LANE), _round_up(B, LANE))
    Bp = _round_up(B, TB)

    # Transpose so batch is on lanes; zero-pad to a whole number of tiles.
    xt = jnp.zeros((D_IN, Bp), x.dtype).at[:, :B].set(x.T)

    resident = lambda a: pl.BlockSpec(a.shape, lambda i: (0, 0))

    weight_bytes = 4 * (H * D_IN + H * H + H * H + D_OUT * H + 3 * H + D_OUT)
    out_t = pl.pallas_call(
        _mlp_kernel,
        out_shape=jax.ShapeDtypeStruct((D_OUT, Bp), jnp.float32),
        grid=(Bp // TB,),
        in_specs=[
            pl.BlockSpec((D_IN, TB), lambda i: (0, i)),   # x tile, pipelined
            resident(w1), resident(b1),
            resident(w2), resident(b2),
            resident(w3), resident(b3),
            resident(w4c), resident(b4),
        ],
        out_specs=pl.BlockSpec((D_OUT, TB), lambda i: (0, i)),
        compiler_params=pltpu.CompilerParams(
            dimension_semantics=("parallel",),            # v7x: shard tiles over both TCs
        ),
        cost_estimate=pl.CostEstimate(
            flops=2 * B * (D_IN * H + H * H + H * H + H * D_OUT),
            transcendentals=B * H,                        # sigmoid
            bytes_accessed=4 * B * (D_IN + D_OUT) + weight_bytes,
        ),
    )(xt, w1, b1, w2, b2, w3, b3, w4c, b4)

    return out_t[:, :B].T                                 # back to (B, 1)


def init_params(key):
    """PyTorch-native shapes: w (out, in), b (out, 1); default U(-1/sqrt(in), 1/sqrt(in))."""
    dims = [(D_IN, H), (H, H), (H, H), (H, D_OUT)]
    params = {}
    keys = jax.random.split(key, 2 * len(dims))
    for i, (fin, fout) in enumerate(dims):
        bound = 1.0 / float(fin) ** 0.5
        params[f"w{i + 1}"] = jax.random.uniform(
            keys[2 * i], (fout, fin), jnp.float32, -bound, bound)
        params[f"b{i + 1}"] = jax.random.uniform(
            keys[2 * i + 1], (fout, 1), jnp.float32, -bound, bound)
    return params


def reference_forward(x, params):
    h = jnp.maximum(x @ params["w1"].T + params["b1"].T, 0.0)
    h = jax.nn.sigmoid(h @ params["w2"].T + params["b2"].T)
    h = jnp.maximum(h @ params["w3"].T + params["b3"].T, 0.0)
    return h @ params["w4"].T + params["b4"].T


if __name__ == "__main__":
    key = jax.random.PRNGKey(0)
    kx, kp = jax.random.split(key)
    params = init_params(kp)

    # Small demo batch (padded internally to one 128-lane tile).
    x_small = jax.random.normal(kx, (8, D_IN), dtype=jnp.float32)
    out_small = jax.block_until_ready(regressor_forward(x_small, params))
    ref_small = reference_forward(x_small, params)
    assert out_small.shape == (8, 1), out_small.shape
    assert jnp.allclose(out_small, ref_small, atol=1e-5, rtol=1e-5), "mismatch (small)"

    # Non-tile-multiple batch with a small tile to exercise the pipelined grid (3 tiles).
    x_big = jax.random.normal(kx, (300, D_IN), dtype=jnp.float32)
    out_big = jax.block_until_ready(regressor_forward(x_big, params, tile_b=128))
    ref_big = reference_forward(x_big, params)
    assert out_big.shape == (300, 1), out_big.shape
    assert jnp.allclose(out_big, ref_big, atol=1e-5, rtol=1e-5), "mismatch (big)"

    print("KERNEL_OK")
</pallas_src>

<mosaic_0001>
module attributes {stable_mosaic.version = 11 : i64} {
  func.func @_mlp_kernel(%arg0: i32, %arg1: memref<2x128xf32, #tpu.memory_space<vmem>>, %arg2: memref<20x2xf32, #tpu.memory_space<vmem>>, %arg3: memref<20x1xf32, #tpu.memory_space<vmem>>, %arg4: memref<20x20xf32, #tpu.memory_space<vmem>>, %arg5: memref<20x1xf32, #tpu.memory_space<vmem>>, %arg6: memref<20x20xf32, #tpu.memory_space<vmem>>, %arg7: memref<20x1xf32, #tpu.memory_space<vmem>>, %arg8: memref<20x1xf32, #tpu.memory_space<vmem>>, %arg9: memref<1x1xf32, #tpu.memory_space<vmem>>, %arg10: memref<1x128xf32, #tpu.memory_space<vmem>>) attributes {dimension_semantics = [#tpu.dimension_semantics<parallel>], iteration_bounds = array<i64: 1>, scalar_prefetch = 0 : i64, scratch_operands = 0 : i64, tpu.core_type = #tpu.core_type<tc>, window_params = [{transform_indices = @transform_0, window_bounds = array<i64: 2, 128>}, {pipeline_mode = #tpu.pipeline_mode<synchronous>, transform_indices = @transform_1, window_bounds = array<i64: 20, 2>}, {pipeline_mode = #tpu.pipeline_mode<synchronous>, transform_indices = @transform_2, window_bounds = array<i64: 20, 1>}, {pipeline_mode = #tpu.pipeline_mode<synchronous>, transform_indices = @transform_3, window_bounds = array<i64: 20, 20>}, {pipeline_mode = #tpu.pipeline_mode<synchronous>, transform_indices = @transform_4, window_bounds = array<i64: 20, 1>}, {pipeline_mode = #tpu.pipeline_mode<synchronous>, transform_indices = @transform_5, window_bounds = array<i64: 20, 20>}, {pipeline_mode = #tpu.pipeline_mode<synchronous>, transform_indices = @transform_6, window_bounds = array<i64: 20, 1>}, {pipeline_mode = #tpu.pipeline_mode<synchronous>, transform_indices = @transform_7, window_bounds = array<i64: 20, 1>}, {pipeline_mode = #tpu.pipeline_mode<synchronous>, transform_indices = @transform_8, window_bounds = array<i64: 1, 1>}, {transform_indices = @transform_9, window_bounds = array<i64: 1, 128>}]} {
    %c0 = arith.constant 0 : index
    %c0_0 = arith.constant 0 : index
    %0 = vector.load %arg1[%c0, %c0_0] : memref<2x128xf32, #tpu.memory_space<vmem>>, vector<2x128xf32>
    %c0_1 = arith.constant 0 : index
    %c0_2 = arith.constant 0 : index
    %1 = vector.load %arg2[%c0_1, %c0_2] : memref<20x2xf32, #tpu.memory_space<vmem>>, vector<20x2xf32>
    %2 = vector.extract_strided_slice %1 {offsets = [0, 0], sizes = [20, 1], strides = [1, 1]} : vector<20x2xf32> to vector<20x1xf32>
    %3 = vector.extract_strided_slice %0 {offsets = [0, 0], sizes = [1, 128], strides = [1, 1]} : vector<2x128xf32> to vector<1x128xf32>
    %4 = vector.broadcast %2 : vector<20x1xf32> to vector<20x128xf32>
    %5 = vector.broadcast %3 : vector<1x128xf32> to vector<20x128xf32>
    %6 = arith.mulf %4, %5 : vector<20x128xf32>
    %7 = vector.extract_strided_slice %1 {offsets = [0, 1], sizes = [20, 1], strides = [1, 1]} : vector<20x2xf32> to vector<20x1xf32>
    %8 = vector.extract_strided_slice %0 {offsets = [1, 0], sizes = [1, 128], strides = [1, 1]} : vector<2x128xf32> to vector<1x128xf32>
    %9 = vector.broadcast %7 : vector<20x1xf32> to vector<20x128xf32>
    %10 = vector.broadcast %8 : vector<1x128xf32> to vector<20x128xf32>
    %11 = arith.mulf %9, %10 : vector<20x128xf32>
    %12 = arith.addf %6, %11 : vector<20x128xf32>
    %c0_3 = arith.constant 0 : index
    %c0_4 = arith.constant 0 : index
    %13 = vector.load %arg3[%c0_3, %c0_4] : memref<20x1xf32, #tpu.memory_space<vmem>>, vector<20x1xf32>
    %14 = vector.broadcast %13 : vector<20x1xf32> to vector<20x128xf32>
    %15 = arith.addf %12, %14 : vector<20x128xf32>
    %cst = arith.constant 0.000000e+00 : f32
    %16 = vector.broadcast %cst : f32 to vector<20x128xf32>
    %17 = arith.maximumf %15, %16 : vector<20x128xf32>
    %c0_5 = arith.constant 0 : index
    %c0_6 = arith.constant 0 : index
    %18 = vector.load %arg4[%c0_5, %c0_6] : memref<20x20xf32, #tpu.memory_space<vmem>>, vector<20x20xf32>
    %cst_7 = arith.constant dense<0.000000e+00> : vector<20x128xf32>
    %19 = tpu.matmul %18, %17, %cst_7 {dimension_numbers = #tpu.dot_dimension_numbers<[1], [0], [0], [1], [0, 0, 1, 1], [], []>} : vector<20x20xf32>, vector<20x128xf32>, vector<20x128xf32> -> vector<20x128xf32>
    %c0_8 = arith.constant 0 : index
    %c0_9 = arith.constant 0 : index
    %20 = vector.load %arg5[%c0_8, %c0_9] : memref<20x1xf32, #tpu.memory_space<vmem>>, vector<20x1xf32>
    %21 = vector.broadcast %20 : vector<20x1xf32> to vector<20x128xf32>
    %22 = arith.addf %19, %21 : vector<20x128xf32>
    %23 = arith.negf %22 : vector<20x128xf32>
    %24 = math.exp %23 : vector<20x128xf32>
    %cst_10 = arith.constant 1.000000e+00 : f32
    %25 = vector.broadcast %cst_10 : f32 to vector<20x128xf32>
    %26 = arith.addf %25, %24 : vector<20x128xf32>
    %27 = arith.divf %25, %26 : vector<20x128xf32>
    %c0_11 = arith.constant 0 : index
    %c0_12 = arith.constant 0 : index
    %28 = vector.load %arg6[%c0_11, %c0_12] : memref<20x20xf32, #tpu.memory_space<vmem>>, vector<20x20xf32>
    %cst_13 = arith.constant dense<0.000000e+00> : vector<20x128xf32>
    %29 = tpu.matmul %28, %27, %cst_13 {dimension_numbers = #tpu.dot_dimension_numbers<[1], [0], [0], [1], [0, 0, 1, 1], [], []>} : vector<20x20xf32>, vector<20x128xf32>, vector<20x128xf32> -> vector<20x128xf32>
    %c0_14 = arith.constant 0 : index
    %c0_15 = arith.constant 0 : index
    %30 = vector.load %arg7[%c0_14, %c0_15] : memref<20x1xf32, #tpu.memory_space<vmem>>, vector<20x1xf32>
    %31 = vector.broadcast %30 : vector<20x1xf32> to vector<20x128xf32>
    %32 = arith.addf %29, %31 : vector<20x128xf32>
    %cst_16 = arith.constant 0.000000e+00 : f32
    %33 = vector.broadcast %cst_16 : f32 to vector<20x128xf32>
    %34 = arith.maximumf %32, %33 : vector<20x128xf32>
    %c0_17 = arith.constant 0 : index
    %c0_18 = arith.constant 0 : index
    %35 = vector.load %arg8[%c0_17, %c0_18] : memref<20x1xf32, #tpu.memory_space<vmem>>, vector<20x1xf32>
    %36 = vector.broadcast %35 : vector<20x1xf32> to vector<20x128xf32>
    %37 = arith.mulf %36, %34 : vector<20x128xf32>
    %cst_19 = arith.constant dense<0.000000e+00> : vector<128xf32>
    %38 = vector.multi_reduction <add>, %37, %cst_19 [0] : vector<20x128xf32> to vector<128xf32>
    %39 = vector.shape_cast %38 : vector<128xf32> to vector<1x128xf32>
    %c0_20 = arith.constant 0 : index
    %c0_21 = arith.constant 0 : index
    %40 = vector.load %arg9[%c0_20, %c0_21] : memref<1x1xf32, #tpu.memory_space<vmem>>, vector<1x1xf32>
    %41 = vector.broadcast %40 : vector<1x1xf32> to vector<1x128xf32>
    %42 = arith.addf %39, %41 : vector<1x128xf32>
    %c0_22 = arith.constant 0 : index
    %c0_23 = arith.constant 0 : index
    %43 = vector.load %arg10[%c0_22, %c0_23] : memref<1x128xf32, #tpu.memory_space<vmem>>, vector<1x128xf32>
    tpu.vector_store %arg10[%c0_22, %c0_23], %42 {strides = array<i32>} : memref<1x128xf32, #tpu.memory_space<vmem>>, vector<1x128xf32>,
    return
  }
  func.func @transform_0(%arg0: i32) -> (i32, i32) {
    %c0_i32 = arith.constant 0 : i32
    %c0_i32_0 = arith.constant 0 : i32
    return %c0_i32, %arg0 : i32, i32
  }
  func.func @transform_1(%arg0: i32) -> (i32, i32) {
    %c0_i32 = arith.constant 0 : i32
    %c0_i32_0 = arith.constant 0 : i32
    %c0_i32_1 = arith.constant 0 : i32
    return %c0_i32, %c0_i32_0 : i32, i32
  }
  func.func @transform_2(%arg0: i32) -> (i32, i32) {
    %c0_i32 = arith.constant 0 : i32
    %c0_i32_0 = arith.constant 0 : i32
    %c0_i32_1 = arith.constant 0 : i32
    return %c0_i32, %c0_i32_0 : i32, i32
  }
  func.func @transform_3(%arg0: i32) -> (i32, i32) {
    %c0_i32 = arith.constant 0 : i32
    %c0_i32_0 = arith.constant 0 : i32
    %c0_i32_1 = arith.constant 0 : i32
    return %c0_i32, %c0_i32_0 : i32, i32
  }
  func.func @transform_4(%arg0: i32) -> (i32, i32) {
    %c0_i32 = arith.constant 0 : i32
    %c0_i32_0 = arith.constant 0 : i32
    %c0_i32_1 = arith.constant 0 : i32
    return %c0_i32, %c0_i32_0 : i32, i32
  }
  func.func @transform_5(%arg0: i32) -> (i32, i32) {
    %c0_i32 = arith.constant 0 : i32
    %c0_i32_0 = arith.constant 0 : i32
    %c0_i32_1 = arith.constant 0 : i32
    return %c0_i32, %c0_i32_0 : i32, i32
  }
  func.func @transform_6(%arg0: i32) -> (i32, i32) {
    %c0_i32 = arith.constant 0 : i32
    %c0_i32_0 = arith.constant 0 : i32
    %c0_i32_1 = arith.constant 0 : i32
    return %c0_i32, %c0_i32_0 : i32, i32
  }
  func.func @transform_7(%arg0: i32) -> (i32, i32) {
    %c0_i32 = arith.constant 0 : i32
    %c0_i32_0 = arith.constant 0 : i32
    %c0_i32_1 = arith.constant 0 : i32
    return %c0_i32, %c0_i32_0 : i32, i32
  }
  func.func @transform_8(%arg0: i32) -> (i32, i32) {
    %c0_i32 = arith.constant 0 : i32
    %c0_i32_0 = arith.constant 0 : i32
    %c0_i32_1 = arith.constant 0 : i32
    return %c0_i32, %c0_i32_0 : i32, i32
  }
  func.func @transform_9(%arg0: i32) -> (i32, i32) {
    %c0_i32 = arith.constant 0 : i32
    %c0_i32_0 = arith.constant 0 : i32
    return %c0_i32, %arg0 : i32, i32
  }
}

</mosaic_0001>

<bundles_post_ra>
// kernel: tpu_custom_call.1
= control target key start
LH: loop header
LB: loop body
LE: loop exit
PB: predicated region body
PF: predicated region fallthrough
CT: control target
= control target key end

     0   :  { %s686_s0 = inlined_call_operand.vmem [shape: f32[2,128], index: 0, kind: input, shape index: {}]   ;;  %s687_s1 = inlined_call_operand.vmem [shape: f32[20,2], index: 1, kind: input, shape index: {}]   ;;  %s688_s2 = inlined_call_operand.vmem [shape: f32[20,1], index: 2, kind: input, shape index: {}]   ;;  %s689_s3 = inlined_call_operand.vmem [shape: f32[20,20], index: 3, kind: input, shape index: {}]   ;;  %s690_s4 = inlined_call_operand.vmem [shape: f32[20,1], index: 4, kind: input, shape index: {}]   ;;  %s691_s5 = inlined_call_operand.vmem [shape: f32[20,20], index: 5, kind: input, shape index: {}]   ;;  %s692_s6 = inlined_call_operand.vmem [shape: f32[20,1], index: 6, kind: input, shape index: {}]   ;;  %s693_s7 = inlined_call_operand.vmem [shape: f32[20,1], index: 7, kind: input, shape index: {}]   ;;  %s694_s8 = inlined_call_operand.<no memory space> [shape: f32[1,1], index: 8, kind: input, shape index: {}]   ;;  %s695_s9 = inlined_call_operand.hbm [shape: f32[1,128], index: 9, kind: output, shape index: {}]  }
   0x1   :  { %v14_v0 = vstv %s694_s8 }
   0x2   :  { %15 = vst [vmem:[#allocation2] sm:$0x1] %v14_v0 }
   0x3   :  { %v36_v1 = vld [vmem:[%s687_s1] sm:$0xff]  ;;  %v518_v2 = vmov 1   ;;  %v519_v3 = vmov 0   ;;  %v37_v4 = vld [vmem:[%s687_s1 + $0x8] sm:$0xff] }
   0x4   :  { %478 = vset.pattern.permute.xlu1 %v518_v2  ;;  %477 = vset.pattern.permute.xlu0 %v519_v3 }
   0x5   :  { %62 = vperm.xlu1 %478, %v36_v1   ;;  %41 = vperm.xlu0 %477, %v36_v1  }
   0x6   :  { %16 = vsyncpa [#allocation4], 0  ;;  %v83_v5 = vld [vmem:[%s688_s2] sm:$0xff]  ;;  %v84_v6 = vld [vmem:[%s688_s2 + $0x8] sm:$0xff]  ;;  %v520_v9 = vmov 0.0|0.0   ;;  %vm521_vm0 = vmmov 0   ;;  %v54_v21 = vlaneseq }
   0x7   :  { %v38_v7 = vld [vmem:[%s687_s1 + $0x10] sm:$0xf]  ;;  %465 = vmatprep.subr.bf16.mxu0 %v520_v9  ;;  %468 = vmatprep.subr.bf16.mxu1 %v520_v9  ;;  %v111_v10 = vld [vmem:[%s690_s4 + $0x8] sm:$0xff]  ;;  %v243_v11 = vld [vmem:[%s692_s6] sm:$0xff]  ;;  %v522_v12 = vmov 0.0   ;;  %vm138_vm1 = vcmask 1043456  }
   0x8   :  { %v85_v8 = vld [vmem:[%s688_s2 + $0x10] sm:$0xf]  ;;  %441 = vmatprep.mubr.msk.f32.mxu0 %vm521_vm0, %v522_v12  ;;  %456 = vmatprep.mubr.msk.f32.mxu1 %vm521_vm0, %v522_v12  ;;  %v357_v14 = vld [vmem:[%s693_s7 + $0x8] sm:$0xff]  ;;  %v110_v16 = vld [vmem:[%s690_s4] sm:$0xff]  ;;  %v626_v22 = vshrl.u32 %v54_v21, 7  ;;  %vm128_vm2 = vcmask 162816  }
   0x9   :  { %66 = vperm.xlu1 %478, %v37_v4   ;;  %46 = vperm.xlu0 %477, %v37_v4   ;;  %v245_v13 = vld [vmem:[%s692_s6 + $0x10] sm:$0xf]  ;;  %v386_v15 = vld [vmem:[#allocation2] sm:$0x1]  ;;  %v244_v18 = vld [vmem:[%s692_s6 + $0x8] sm:$0xff] }
   0xa   :  { %v112_v17 = vld [vmem:[%s690_s4 + $0x10] sm:$0xf]  ;;  %v356_v19 = vld [vmem:[%s693_s7] sm:$0xff]  ;;  %v75_v23 = vsub.s32 1, %v626_v22  ;;  %v56_v24 = vsub.s32 0, %v626_v22  ;;  %v108_v54 = vld [vmem:[%s689_s3 + $0x8] sm:$0xff] }
   0xb   :  { %v358_v20 = vld [vmem:[%s693_s7 + $0x10] sm:$0xf]  ;;  %v35_v25 = vld [vmem:[%s686_s0] sm:$0x3] }
   0xc   :  { %v76_v26 = vrot.slane %v35_v25, %v75_v23  ;;  %v57_v27 = vrot.slane %v35_v25, %v56_v24  ;;  %v107_v53 = vld [vmem:[%s689_s3] sm:$0xff]  ;;  %v109_v55 = vld [vmem:[%s689_s3 + $0x10] sm:$0xf] }
   0xd   :  { %479 = vset.pattern.permute.xlu1 %v519_v3  ;;  %88 = vperm.xlu0 %477, %v83_v5  }
   0xe   :  { %93 = vperm.xlu1 %479, %v84_v6  }
  0x11   :  { %51 = vperm.xlu0 %477, %v38_v7  }
  0x12   :  { %480 = vset.pattern.permute.xlu1 %v518_v2 }
  0x13   :  { %70 = vperm.xlu1 %480, %v38_v7  }
  0x15   :  { %98 = vperm.xlu0 %477, %v85_v8  }
  0x17   :  { %481 = vset.pattern.permute.xlu1 %v519_v3 }
  0x18   :  { %115 = vperm.xlu1 %481, %v110_v16  }
  0x19   :  { %120 = vperm.xlu0 %477, %v111_v10  }
  0x1c   :  { %125 = vperm.xlu1 %481, %v112_v17   ;;  %v240_v17 = vld [vmem:[%s691_s5] sm:$0xff] }
  0x1d   :  { %248 = vperm.xlu0 %477, %v243_v11  }
  0x20   :  { %253 = vperm.xlu1 %481, %v244_v18  }
  0x21   :  { %258 = vperm.xlu0 %477, %v245_v13  }
  0x24   :  { %361 = vperm.xlu1 %481, %v356_v19   ;;  %v241_v19 = vld [vmem:[%s691_s5 + $0x8] sm:$0xff] }
  0x25   :  { %366 = vperm.xlu0 %477, %v357_v14  }
  0x28   :  { %371 = vperm.xlu1 %481, %v358_v20   ;;  %v242_v20 = vld [vmem:[%s691_s5 + $0x10] sm:$0xf]  ;;  %s523_s5 = smov [#allocation3]  }
  0x29   :  { %389 = vperm.xlu0 %477, %v386_v15   ;;  %s404_s25 = sshll.u32 %s523_s5, 4  ;;  %s405_s25 = int_to_ptr.vmem [resolvable:$true] %s404_s25 }
  0x2a   :  { %s494_s1 = scalar_lea.vmem %s405_s25, 16  ;;  %s498_s2 = scalar_lea.vmem %s405_s25, 32 }
  0x2b   :  { %p495_p0 = scmp.ne.s32.totalorder %s405_s25, %s494_s1  ;;  %p499_p1 = scmp.lt.s32.totalorder %s405_s25, %s405_s25 }
  0x2c   :  { %p500_p2 = scmp.lt.s32.totalorder %s498_s2, %s494_s1 }
  0x2e   :  { %p501_p3 = por %p500_p2, %p499_p1 }
  0x30   :  { %p502_p4 = pnand %p501_p3, %p495_p0 }
  0x84   :  { %v63_v28 = vpop.permute.xlu1 %62  ;;  %v42_v29 = vpop.permute.xlu0 %41 }
  0x85   :  { %v77_v30 = vmul.f32 %v76_v26, %v63_v28  ;;  %v58_v31 = vmul.f32 %v57_v27, %v42_v29 }
  0x87   :  { %v80_v36 = vadd.f32 %v77_v30, %v58_v31 }
  0x88   :  { %v67_v32 = vpop.permute.xlu1 %66  ;;  %v47_v33 = vpop.permute.xlu0 %46 }
  0x89   :  { %v78_v34 = vmul.f32 %v76_v26, %v67_v32  ;;  %v59_v35 = vmul.f32 %v57_v27, %v47_v33 }
  0x8b   :  { %v81_v37 = vadd.f32 %v78_v34, %v59_v35 }
  0x8c   :  { %v89_v38 = vpop.permute.xlu0 %88 }
  0x8d   :  { %v101_v39 = vadd.f32 %v89_v38, %v80_v36  ;;  %v94_v40 = vpop.permute.xlu1 %93 }
  0x8e   :  { %v102_v41 = vadd.f32 %v94_v40, %v81_v37 }
  0x8f   :  { %v104_v42 = vmax.f32 %v101_v39, 0.0 }
  0x90   :  { %v105_v43 = vmax.f32 %v102_v41, 0.0  ;;  %v52_v44 = vpop.permute.xlu0 %51 }
  0x91   :  { %v60_v47 = vmul.f32 %v57_v27, %v52_v44 }
  0x92   :  { %v71_v45 = vpop.permute.xlu1 %70  ;;  %v466_v46 = vpack.c.bf16 %v105_v43, %v104_v42 }
  0x93   :  { %v79_v48 = vmul.f32 %v76_v26, %v71_v45 }
  0x94   :  { %467 = vmatpush3.bf16.msra.mxu0 %v466_v46  ;;  %v99_v50 = vpop.permute.xlu0 %98 }
  0x95   :  { %v82_v49 = vadd.f32 %v79_v48, %v60_v47  ;;  %439 = vmatprep.subr.mxu0 %v522_v12 }
  0x97   :  { %v103_v51 = vadd.f32 %v99_v50, %v82_v49  ;;  %v116_v56 = vpop.permute.xlu1 %115 }
  0x98   :  { %v121_v61 = vpop.permute.xlu0 %120 }
  0x99   :  { %v106_v52 = vmax.f32 %v103_v51, 0.0 }
  0x9b   :  { %440 = vmatpush3.msk.msra.mxu0 %vm138_vm1, %v106_v52  ;;  %v126_v2 = vpop.permute.xlu1 %125 }
  0x9c   :  { %442 = vmatmul.mubr.msk.f32.vlgmr.msra.gmra.mrb[0].mxu0 %vm128_vm2, %v107_v53  ;;  %v249_v21 = vpop.permute.xlu0 %248 }
  0x9d   :  { %444 = vmatprep.mubr.msk.f32.mxu0 %vm521_vm0, %v522_v12 }
  0x9f   :  { %v254_v23 = vpop.permute.xlu1 %253 }
  0xa0   :  { %445 = vmatmul.mubr.msk.f32.gmra.mrb[2].mxu0 %vm128_vm2, %v108_v54  ;;  %v259_v28 = vpop.permute.xlu0 %258 }
  0xa1   :  { %447 = vmatprep.mubr.msk.f32.mxu0 %vm521_vm0, %v522_v12 }
  0xa3   :  { %v362_v33 = vpop.permute.xlu1 %361 }
  0xa4   :  { %448 = vmatmul.mubr.msk.f32.gmra.mrb[4].mxu0 %vm128_vm2, %v109_v55  ;;  %v367_v35 = vpop.permute.xlu0 %366 }
  0xa7   :  { %v372_v42 = vpop.permute.xlu1 %371 }
  0xa8   :  { %v390_v50 = vpop.permute.xlu0 %389 }
  0xa9   :  { %v395_v52 = vrot.slane %v390_v50, %v56_v24 }
 0x16f   :  { %v208_v57 = vpop.f32.mrb[0].mxu0 }
 0x170   :  { %v209_v58 = vadd.f32 %v208_v57, %v116_v56  ;;  %v443_v59 = vpop.f32.mrb[1].mxu0 }
 0x172   :  { %v416_v60 = vmul.f32 -1.442695, %v209_v58 }
 0x173   :  { %v213_v62 = vpop.f32.mrb[2].mxu0 }
 0x174   :  { %482 = vpow2.f32 %v416_v60  ;;  %v214_v63 = vadd.f32 %v213_v62, %v121_v61  ;;  %v446_v0 = vpop.f32.mrb[3].mxu0 }
 0x176   :  { %v417_v1 = vmul.f32 -1.442695, %v214_v63 }
 0x177   :  { %v218_v3 = vpop.f32.mrb[4].mxu0 }
 0x178   :  { %484 = vpow2.f32 %v417_v1  ;;  %v219_v4 = vadd.f32 %v218_v3, %v126_v2  ;;  %v449_v5 = vpop.f32.mrb[5].mxu0 }
 0x17a   :  { %v418_v6 = vmul.f32 -1.442695, %v219_v4 }
 0x17c   :  { %486 = vpow2.f32 %v418_v6 }
 0x17e   :  { %v483_v7 = vpop.eup %482 }
 0x17f   :  { %v231_v8 = vadd.f32 1.0, %v483_v7 }
 0x181   :  { %488 = vrcp.f32 %v231_v8 }
 0x182   :  { %v485_v9 = vpop.eup %484 }
 0x183   :  { %v232_v10 = vadd.f32 1.0, %v485_v9 }
 0x185   :  { %490 = vrcp.f32 %v232_v10 }
 0x186   :  { %v487_v11 = vpop.eup %486 }
 0x187   :  { %v233_v13 = vadd.f32 1.0, %v487_v11 }
 0x189   :  { %492 = vrcp.f32 %v233_v13 }
 0x18b   :  { %v489_v14 = vpop.eup %488 }
 0x18f   :  { %v491_v15 = vpop.eup %490 }
 0x190   :  { %v469_v16 = vpack.c.bf16 %v491_v15, %v489_v14 }
 0x192   :  { %470 = vmatpush3.bf16.msra.mxu1 %v469_v16 }
 0x193   :  { %454 = vmatprep.subr.mxu1 %v522_v12  ;;  %v493_v18 = vpop.eup %492 }
 0x196   :  { %455 = vmatpush3.msk.msra.mxu1 %vm138_vm1, %v493_v18 }
 0x197   :  { %457 = vmatmul.mubr.msk.f32.vlgmr.msra.gmra.mrb[0].mxu1 %vm128_vm2, %v240_v17 }
 0x198   :  { %459 = vmatprep.mubr.msk.f32.mxu1 %vm521_vm0, %v522_v12 }
 0x19b   :  { %460 = vmatmul.mubr.msk.f32.gmra.mrb[2].mxu1 %vm128_vm2, %v241_v19 }
 0x19c   :  { %462 = vmatprep.mubr.msk.f32.mxu1 %vm521_vm0, %v522_v12 }
 0x19f   :  { %463 = vmatmul.mubr.msk.f32.gmra.mrb[4].mxu1 %vm128_vm2, %v242_v20 }
 0x26a   :  { %v339_v25 = vpop.f32.mrb[0].mxu1 }
 0x26b   :  { %v340_v26 = vadd.f32 %v339_v25, %v249_v21  ;;  %v458_v27 = vpop.f32.mrb[1].mxu1 }
 0x26d   :  { %v353_v30 = vmax.f32 %v340_v26, 0.0 }
 0x26e   :  { %v344_v29 = vpop.f32.mrb[2].mxu1 }
 0x26f   :  { %v345_v31 = vadd.f32 %v344_v29, %v254_v23  ;;  %v461_v32 = vpop.f32.mrb[3].mxu1  ;;  %v374_v36 = vmul.f32 %v362_v33, %v353_v30 }
 0x271   :  { %v354_v34 = vmax.f32 %v345_v31, 0.0 }
 0x272   :  { %v349_v12 = vpop.f32.mrb[4].mxu1 }
 0x273   :  { %v375_v37 = vmul.f32 %v367_v35, %v354_v34  ;;  %v350_v38 = vadd.f32 %v349_v12, %v259_v28  ;;  %v464_v39 = vpop.f32.mrb[5].mxu1 }
 0x275   :  { %v377_v40 = vadd.f32 %v375_v37, %v374_v36  ;;  %v355_v41 = vmax.f32 %v350_v38, 0.0 }
 0x277   :  { %v376_v43 = vmul.f32 %v372_v42, %v355_v41 }
 0x279   :  { %v378_v44 = vsel %vm138_vm1, %v376_v43, 0.0 }
 0x27a   :  { %v379_v45 = vadd.f32 %v378_v44, %v377_v40 }
 0x27c   :  { %v380_v46 = vrot.slane %v379_v45, 4 }
 0x27e   :  { %v381_v47 = vadd.f32 %v380_v46, %v379_v45 }
 0x280   :  { %v382_v48 = vrot.slane %v381_v47, 2 }
 0x282   :  { %v383_v49 = vadd.f32 %v382_v48, %v381_v47 }
 0x284   :  { %v384_v51 = vrot.slane %v383_v49, 1 }
 0x286   :  { %v385_v53 = vadd.f32 %v384_v51, %v383_v49 }
 0x288   :  { %v396_v54 = vadd.f32 %v395_v52, %v385_v53 }
 0x28a   :  { %397 = vst [vmem:[#allocation3] sm:$0x1] %v396_v54 }
 0x28b   :  { %505 = shalt.err (!%p502_p4)
}
 0x28c   :  { %s506_s28 = scalar_lea.hbm %s695_s9, 16 }
 0x28d   :  { %p507_p5 = scmp.ne.s32.totalorder %s695_s9, %s506_s28  ;;  %p510_p6 = scmp.lt.u32.totalorder %s506_s28, %s695_s9 }
 0x28f   :  { %p512_p7 = pnand %p510_p6, %p507_p5 }
 0x291   :  { %515 = shalt.err (!%p512_p7)
}
 0x292   :  { %407 = dma.vmem_to_hbm [thread:$0]  %s405_s25, 16, %s695_s9, [#allocation4]  }
 0x293   :  { %516 = dma.done.wait [#allocation4], 16  }
 0x294   :  { %517 = vsyncadd [#allocation4], 4294967280 }
 0x295   :  { %411 = vsyncpa [#allocation4], 1 }

</bundles_post_ra>
